<compile_context>
chip_gen: v7x
topology: tpu7x:2x2x1
jax: 0.10.0
libtpu: 0.0.40
codegen_flags: <defaults>
</compile_context>

<pallas_src>
import math

import jax
import jax.numpy as jnp
from jax import lax
from jax.experimental import pallas as pl
from jax.experimental.pallas import tpu as pltpu


# ----------------------------- Pallas kernel ---------------------------------


def _egp_kernel(
    xm_ref,     # [1, TM, H]   row-tile of sequence features
    xn_ref,     # [1, TN, H]   col-tile of sequence features
    wp_ref,     # [H, 2D]      p_dense weight
    bp_ref,     # [1, 2D]      p_dense bias
    wq0_ref,    # [2D, heads]  q_dense weight, even output columns (start bias)
    bq0_ref,    # [1, heads]
    wq1_ref,    # [2D, heads]  q_dense weight, odd output columns (end bias)
    bq1c_ref,   # [heads, 1]
    cosm_ref,   # [TM, D]      RoPE cos rows for m-tile (pair-repeated)
    sinm_ref,   # [TM, D]
    cosn_ref,   # [TN, D]      RoPE cos rows for n-tile
    sinn_ref,   # [TN, D]
    prot_ref,   # [D, D]       signed pair-swap matrix: x @ prot == stack([-x_odd, x_even])
    out_ref,    # [1, heads, TM, TN]
):
    TM, D = cosm_ref.shape
    TN = cosn_ref.shape[0]
    heads = out_ref.shape[1]

    mi = pl.program_id(1)
    ni = pl.program_id(2)

    xm = xm_ref[0]           # [TM, H]
    xn = xn_ref[0]           # [TN, H]
    wp = wp_ref[...]
    bp = bp_ref[...]
    prot = prot_ref[...]

    # p_dense on the row / col slices of this tile.
    so_m = jnp.dot(xm, wp, preferred_element_type=jnp.float32) + bp   # [TM, 2D]
    so_n = jnp.dot(xn, wp, preferred_element_type=jnp.float32) + bp   # [TN, 2D]

    qw = so_m[:, :D]
    kw = so_n[:, D:]

    # Interleaved RoPE: x*cos + rotate_pairs(x)*sin; pair rotation via the
    # precomputed signed permutation matrix (MXU, avoids strided lane slicing).
    qw = qw * cosm_ref[...] + jnp.dot(qw, prot, preferred_element_type=jnp.float32) * sinm_ref[...]
    kw = kw * cosn_ref[...] + jnp.dot(kw, prot, preferred_element_type=jnp.float32) * sinn_ref[...]

    # Fold the 1/sqrt(D) scale into qw (scales TM*D elems instead of TM*TN).
    qw = qw * jnp.float32(1.0 / (D ** 0.5))

    # einsum('md,nd->mn') score tile.
    qk = lax.dot_general(
        qw, kw, (((1,), (1,)), ((), ())), preferred_element_type=jnp.float32
    )  # [TM, TN]

    # Fused strictly-lower-triangular mask (tril(ones, -1) * 1e12), with the
    # global row/col offsets of this tile.
    row = mi * TM + lax.broadcasted_iota(jnp.int32, (TM, TN), 0)
    col = ni * TN + lax.broadcasted_iota(jnp.int32, (TM, TN), 1)
    qk = jnp.where(row > col, qk - jnp.float32(1e12), qk)

    # q_dense start/end biases for this tile's rows / cols.
    bias0 = jnp.dot(so_m, wq0_ref[...], preferred_element_type=jnp.float32) + bq0_ref[...]   # [TM, heads]
    # bias1 produced already transposed ([heads, TN]) so per-head rows are
    # cheap sublane slices (no per-head transpose).
    bias1t = lax.dot_general(
        wq1_ref[...], so_n, (((0,), (1,)), ((), ())), preferred_element_type=jnp.float32
    ) + bq1c_ref[...]                                                                         # [heads, TN]

    # Per-head slabs: out[h] = masked_qk + bias0[:, h, None] + bias1[None, :, h].
    # heads is small & static -> unrolled Python loop; each store is a full
    # lane-dense [TM, TN] slab.
    for h in range(heads):
        out_ref[0, h] = qk + bias0[:, h:h + 1] + bias1t[h:h + 1, :]


# ------------------------------ JAX wrapper -----------------------------------


def efficient_global_pointer(x, Wp, bp, Wq, bq, cos, sin, prot,
                             *, block_m=None, block_n=None):
    """x: [B, L, H] f32 -> logits [B, heads, L, L] (PyTorch layout), no wrapper transpose."""
    B, L, H = x.shape
    D = cos.shape[1]
    heads = Wq.shape[1] // 2

    # Tile the L x L score plane; 256 keeps the double-buffered output block
    # well inside default scoped VMEM on v5e/v6e/v7x at typical `heads`.
    if block_m is None:
        block_m = L if L <= 256 else 256
    if block_n is None:
        block_n = L if L <= 256 else 256
    assert L % block_m == 0 and L % block_n == 0
    gm, gn = L // block_m, L // block_n

    # glue: split q_dense columns into (start, end) halves; biases as 2D.
    Wq0 = Wq[:, 0::2]                 # even output columns -> start bias (row index)
    Wq1 = Wq[:, 1::2]                 # odd output columns  -> end bias (col index)
    bq0 = bq[0::2][None, :]           # [1, heads]
    bq1c = bq[1::2][:, None]          # [heads, 1]
    bp2 = bp[None, :]                 # [1, 2D]

    out = pl.pallas_call(
        _egp_kernel,
        out_shape=jax.ShapeDtypeStruct((B, heads, L, L), jnp.float32),
        grid_spec=pltpu.PrefetchScalarGridSpec(
            num_scalar_prefetch=0,
            grid=(B, gm, gn),
            in_specs=[
                pl.BlockSpec((1, block_m, H), lambda b, mi, ni: (b, mi, 0)),   # x rows (m-tile)
                pl.BlockSpec((1, block_n, H), lambda b, mi, ni: (b, ni, 0)),   # x rows (n-tile)
                pl.BlockSpec((H, 2 * D), lambda b, mi, ni: (0, 0)),
                pl.BlockSpec((1, 2 * D), lambda b, mi, ni: (0, 0)),
                pl.BlockSpec((2 * D, heads), lambda b, mi, ni: (0, 0)),
                pl.BlockSpec((1, heads), lambda b, mi, ni: (0, 0)),
                pl.BlockSpec((2 * D, heads), lambda b, mi, ni: (0, 0)),
                pl.BlockSpec((heads, 1), lambda b, mi, ni: (0, 0)),
                pl.BlockSpec((block_m, D), lambda b, mi, ni: (mi, 0)),
                pl.BlockSpec((block_m, D), lambda b, mi, ni: (mi, 0)),
                pl.BlockSpec((block_n, D), lambda b, mi, ni: (ni, 0)),
                pl.BlockSpec((block_n, D), lambda b, mi, ni: (ni, 0)),
                pl.BlockSpec((D, D), lambda b, mi, ni: (0, 0)),
            ],
            out_specs=pl.BlockSpec((1, heads, block_m, block_n),
                                   lambda b, mi, ni: (b, 0, mi, ni)),
        ),
        compiler_params=pltpu.CompilerParams(
            dimension_semantics=("parallel", "parallel", "parallel")),
    )(x, x, Wp, bp2, Wq0, bq0, Wq1, bq1c, cos, sin, cos, sin, prot)

    return out


# ------------------------- parameter / table helpers ---------------------------


def rope_cos_sin(seq_len, d):
    """Pair-repeated cos/sin tables, matching RoPEPositionEncoding buffers."""
    pos = jnp.arange(seq_len, dtype=jnp.float32)[:, None]
    div = jnp.exp(jnp.arange(0, d, 2, dtype=jnp.float32) * (-math.log(10000.0) / d))
    ang = pos * div[None, :]                      # [L, D/2]
    cos = jnp.repeat(jnp.cos(ang), 2, axis=-1)    # [L, D]
    sin = jnp.repeat(jnp.sin(ang), 2, axis=-1)    # [L, D]
    return cos, sin


def make_rot_matrix(d):
    """prot s.t. (x @ prot)[..., 2k] = -x[..., 2k+1], (x @ prot)[..., 2k+1] = x[..., 2k]."""
    m = jnp.zeros((d, d), jnp.float32)
    idx = jnp.arange(0, d, 2)
    m = m.at[idx + 1, idx].set(-1.0)
    m = m.at[idx, idx + 1].set(1.0)
    return m


def multilabel_categorical_crossentropy(y_pred, y_true):
    """Plain-JAX MyLoss (glue; only used when labels are provided)."""
    B, C = y_pred.shape[0], y_pred.shape[1]
    y_pred = y_pred.reshape(B * C, -1)
    y_true = y_true.reshape(B * C, -1).astype(jnp.float32)
    y_pred = (1.0 - 2.0 * y_true) * y_pred
    y_pred_pos = y_pred - (1.0 - y_true) * 1e12
    y_pred_neg = y_pred - y_true * 1e12
    zeros = jnp.zeros((y_pred.shape[0], 1), jnp.float32)
    pos_loss = jax.nn.logsumexp(jnp.concatenate([y_pred_pos, zeros], axis=-1), axis=-1)
    neg_loss = jax.nn.logsumexp(jnp.concatenate([y_pred_neg, zeros], axis=-1), axis=-1)
    return (pos_loss + neg_loss).mean()


# --------------------------- pure-JAX reference --------------------------------


def _ref_rope(x, cos, sin):
    x2 = jnp.stack([-x[..., 1::2], x[..., ::2]], axis=-1).reshape(x.shape)
    return x * cos + x2 * sin


def ref_efficient_global_pointer(x, Wp, bp, Wq, bq, cos, sin, heads, D):
    hp = lax.Precision.HIGHEST
    so = jnp.einsum("blh,hd->bld", x, Wp, precision=hp) + bp
    qw, kw = so[..., :D], so[..., D:]
    qw = _ref_rope(qw, cos, sin)
    kw = _ref_rope(kw, cos, sin)
    logits = jnp.einsum("bmd,bnd->bmn", qw, kw, precision=hp) / (D ** 0.5)
    bias_input = jnp.einsum("bld,dk->blk", so, Wq, precision=hp) + bq
    B, L, _ = x.shape
    bias = bias_input.reshape(B, L, heads, 2).transpose(0, 2, 1, 3)   # [B, heads, L, 2]
    logits = logits[:, None] + bias[..., :1] + jnp.swapaxes(bias[..., 1:], 2, 3)
    tril = jnp.tril(jnp.ones((L, L), jnp.float32), -1) * 1e12
    return logits - tril


# ----------------------------------- main --------------------------------------


if __name__ == "__main__":
    B, L, H, D, heads, vocab = 2, 8, 32, 16, 4, 100

    key = jax.random.PRNGKey(0)
    k_emb, k_tok, k_wp, k_bp, k_wq, k_bq = jax.random.split(key, 6)

    # TODO(synk): BertModel.from_pretrained has no Pallas equivalent; the encoder is
    # stubbed with a deterministic embedding lookup producing sequence_output [B, L, H].
    emb_table = jax.random.normal(k_emb, (vocab, H), jnp.float32) * 0.1
    token_ids = jax.random.randint(k_tok, (B, L), 0, vocab)
    attention_masks = jnp.ones((B, L), jnp.int32)
    sequence_output = emb_table[token_ids]                       # "output[0]" of BERT

    # EfficientGlobalPointer(hidden_size=H, heads=num_tags, head_size=D) parameters.
    Wp = jax.random.normal(k_wp, (H, 2 * D), jnp.float32) * 0.05          # p_dense.weight^T
    bp = jax.random.normal(k_bp, (2 * D,), jnp.float32) * 0.05            # p_dense.bias
    Wq = jax.random.normal(k_wq, (2 * D, 2 * heads), jnp.float32) * 0.05  # q_dense.weight^T
    bq = jax.random.normal(k_bq, (2 * heads,), jnp.float32) * 0.05        # q_dense.bias

    cos, sin = rope_cos_sin(L, D)
    prot = make_rot_matrix(D)

    # GlobalPointerNer.forward with labels=None -> logits only (mask arg is unused
    # because EfficientGlobalPointer receives attention_masks as `event_inputs`).
    logits = efficient_global_pointer(sequence_output, Wp, bp, Wq, bq, cos, sin, prot)
    logits = jax.block_until_ready(logits)

    assert logits.shape == (B, heads, L, L)
    assert logits.dtype == jnp.float32

    ref = ref_efficient_global_pointer(sequence_output, Wp, bp, Wq, bq, cos, sin, heads, D)

    # Optional labels path (plain-JAX glue), just exercised for completeness.
    labels = (jax.random.uniform(jax.random.PRNGKey(1), (B, heads, L, L)) > 0.95).astype(jnp.int32)
    _ = jax.block_until_ready(multilabel_categorical_crossentropy(logits, labels))

    if bool(jnp.allclose(logits, ref, atol=1e-2, rtol=1e-3)):
        print("KERNEL_OK")
    else:
        print("MISMATCH max_abs_err=", float(jnp.max(jnp.abs(logits - ref))))
</pallas_src>

<mosaic_0001>
module attributes {stable_mosaic.version = 11 : i64} {
  func.func @_egp_kernel(%arg0: i32, %arg1: i32, %arg2: i32, %arg3: memref<1x8x32xf32, #tpu.memory_space<vmem>>, %arg4: memref<1x8x32xf32, #tpu.memory_space<vmem>>, %arg5: memref<32x32xf32, #tpu.memory_space<vmem>>, %arg6: memref<1x32xf32, #tpu.memory_space<vmem>>, %arg7: memref<32x4xf32, #tpu.memory_space<vmem>>, %arg8: memref<1x4xf32, #tpu.memory_space<vmem>>, %arg9: memref<32x4xf32, #tpu.memory_space<vmem>>, %arg10: memref<4x1xf32, #tpu.memory_space<vmem>>, %arg11: memref<8x16xf32, #tpu.memory_space<vmem>>, %arg12: memref<8x16xf32, #tpu.memory_space<vmem>>, %arg13: memref<8x16xf32, #tpu.memory_space<vmem>>, %arg14: memref<8x16xf32, #tpu.memory_space<vmem>>, %arg15: memref<16x16xf32, #tpu.memory_space<vmem>>, %arg16: memref<1x4x8x8xf32, #tpu.memory_space<vmem>>) attributes {dimension_semantics = [#tpu.dimension_semantics<parallel>, #tpu.dimension_semantics<parallel>, #tpu.dimension_semantics<parallel>], iteration_bounds = array<i64: 2, 1, 1>, scalar_prefetch = 0 : i64, scratch_operands = 0 : i64, tpu.core_type = #tpu.core_type<tc>, window_params = [{transform_indices = @transform_0, window_bounds = array<i64: 1, 8, 32>}, {transform_indices = @transform_1, window_bounds = array<i64: 1, 8, 32>}, {pipeline_mode = #tpu.pipeline_mode<synchronous>, transform_indices = @transform_2, window_bounds = array<i64: 32, 32>}, {pipeline_mode = #tpu.pipeline_mode<synchronous>, transform_indices = @transform_3, window_bounds = array<i64: 1, 32>}, {pipeline_mode = #tpu.pipeline_mode<synchronous>, transform_indices = @transform_4, window_bounds = array<i64: 32, 4>}, {pipeline_mode = #tpu.pipeline_mode<synchronous>, transform_indices = @transform_5, window_bounds = array<i64: 1, 4>}, {pipeline_mode = #tpu.pipeline_mode<synchronous>, transform_indices = @transform_6, window_bounds = array<i64: 32, 4>}, {pipeline_mode = #tpu.pipeline_mode<synchronous>, transform_indices = @transform_7, window_bounds = array<i64: 4, 1>}, {transform_indices = @transform_8, window_bounds = array<i64: 8, 16>}, {transform_indices = @transform_9, window_bounds = array<i64: 8, 16>}, {transform_indices = @transform_10, window_bounds = array<i64: 8, 16>}, {transform_indices = @transform_11, window_bounds = array<i64: 8, 16>}, {pipeline_mode = #tpu.pipeline_mode<synchronous>, transform_indices = @transform_12, window_bounds = array<i64: 16, 16>}, {transform_indices = @transform_13, window_bounds = array<i64: 1, 4, 8, 8>}]} {
    %c0 = arith.constant 0 : index
    %c0_0 = arith.constant 0 : index
    %c0_1 = arith.constant 0 : index
    %0 = vector.load %arg3[%c0, %c0_0, %c0_1] : memref<1x8x32xf32, #tpu.memory_space<vmem>>, vector<1x8x32xf32>
    %1 = vector.shape_cast %0 : vector<1x8x32xf32> to vector<8x32xf32>
    %c0_2 = arith.constant 0 : index
    %c0_3 = arith.constant 0 : index
    %c0_4 = arith.constant 0 : index
    %2 = vector.load %arg4[%c0_2, %c0_3, %c0_4] : memref<1x8x32xf32, #tpu.memory_space<vmem>>, vector<1x8x32xf32>
    %3 = vector.shape_cast %2 : vector<1x8x32xf32> to vector<8x32xf32>
    %c0_5 = arith.constant 0 : index
    %c0_6 = arith.constant 0 : index
    %4 = vector.load %arg5[%c0_5, %c0_6] : memref<32x32xf32, #tpu.memory_space<vmem>>, vector<32x32xf32>
    %c0_7 = arith.constant 0 : index
    %c0_8 = arith.constant 0 : index
    %5 = vector.load %arg6[%c0_7, %c0_8] : memref<1x32xf32, #tpu.memory_space<vmem>>, vector<1x32xf32>
    %c0_9 = arith.constant 0 : index
    %c0_10 = arith.constant 0 : index
    %6 = vector.load %arg15[%c0_9, %c0_10] : memref<16x16xf32, #tpu.memory_space<vmem>>, vector<16x16xf32>
    %cst = arith.constant dense<0.000000e+00> : vector<8x32xf32>
    %7 = tpu.matmul %1, %4, %cst {dimension_numbers = #tpu.dot_dimension_numbers<[1], [0], [0], [1], [0, 0, 1, 1], [], []>} : vector<8x32xf32>, vector<32x32xf32>, vector<8x32xf32> -> vector<8x32xf32>
    %8 = vector.broadcast %5 : vector<1x32xf32> to vector<8x32xf32>
    %9 = arith.addf %7, %8 : vector<8x32xf32>
    %cst_11 = arith.constant dense<0.000000e+00> : vector<8x32xf32>
    %10 = tpu.matmul %3, %4, %cst_11 {dimension_numbers = #tpu.dot_dimension_numbers<[1], [0], [0], [1], [0, 0, 1, 1], [], []>} : vector<8x32xf32>, vector<32x32xf32>, vector<8x32xf32> -> vector<8x32xf32>
    %11 = vector.broadcast %5 : vector<1x32xf32> to vector<8x32xf32>
    %12 = arith.addf %10, %11 : vector<8x32xf32>
    %13 = vector.extract_strided_slice %9 {offsets = [0, 0], sizes = [8, 16], strides = [1, 1]} : vector<8x32xf32> to vector<8x16xf32>
    %14 = vector.extract_strided_slice %12 {offsets = [0, 16], sizes = [8, 16], strides = [1, 1]} : vector<8x32xf32> to vector<8x16xf32>
    %c0_12 = arith.constant 0 : index
    %c0_13 = arith.constant 0 : index
    %15 = vector.load %arg11[%c0_12, %c0_13] : memref<8x16xf32, #tpu.memory_space<vmem>>, vector<8x16xf32>
    %16 = arith.mulf %13, %15 : vector<8x16xf32>
    %cst_14 = arith.constant dense<0.000000e+00> : vector<8x16xf32>
    %17 = tpu.matmul %13, %6, %cst_14 {dimension_numbers = #tpu.dot_dimension_numbers<[1], [0], [0], [1], [0, 0, 1, 1], [], []>} : vector<8x16xf32>, vector<16x16xf32>, vector<8x16xf32> -> vector<8x16xf32>
    %c0_15 = arith.constant 0 : index
    %c0_16 = arith.constant 0 : index
    %18 = vector.load %arg12[%c0_15, %c0_16] : memref<8x16xf32, #tpu.memory_space<vmem>>, vector<8x16xf32>
    %19 = arith.mulf %17, %18 : vector<8x16xf32>
    %20 = arith.addf %16, %19 : vector<8x16xf32>
    %c0_17 = arith.constant 0 : index
    %c0_18 = arith.constant 0 : index
    %21 = vector.load %arg13[%c0_17, %c0_18] : memref<8x16xf32, #tpu.memory_space<vmem>>, vector<8x16xf32>
    %22 = arith.mulf %14, %21 : vector<8x16xf32>
    %cst_19 = arith.constant dense<0.000000e+00> : vector<8x16xf32>
    %23 = tpu.matmul %14, %6, %cst_19 {dimension_numbers = #tpu.dot_dimension_numbers<[1], [0], [0], [1], [0, 0, 1, 1], [], []>} : vector<8x16xf32>, vector<16x16xf32>, vector<8x16xf32> -> vector<8x16xf32>
    %c0_20 = arith.constant 0 : index
    %c0_21 = arith.constant 0 : index
    %24 = vector.load %arg14[%c0_20, %c0_21] : memref<8x16xf32, #tpu.memory_space<vmem>>, vector<8x16xf32>
    %25 = arith.mulf %23, %24 : vector<8x16xf32>
    %26 = arith.addf %22, %25 : vector<8x16xf32>
    %cst_22 = arith.constant 2.500000e-01 : f32
    %27 = vector.broadcast %cst_22 : f32 to vector<8x16xf32>
    %28 = arith.mulf %20, %27 : vector<8x16xf32>
    %cst_23 = arith.constant dense<0.000000e+00> : vector<8x8xf32>
    %29 = tpu.matmul %28, %26, %cst_23 {dimension_numbers = #tpu.dot_dimension_numbers<[1], [1], [0], [0], [0, 0, 1, 0], [], []>} : vector<8x16xf32>, vector<8x16xf32>, vector<8x8xf32> -> vector<8x8xf32>
    %c8_i32 = arith.constant 8 : i32
    %30 = arith.muli %arg1, %c8_i32 : i32
    %31 = tpu.iota {dimensions = array<i32: 0>} : vector<8x8xi32>
    %32 = vector.broadcast %30 : i32 to vector<8x8xi32>
    %33 = arith.addi %32, %31 : vector<8x8xi32>
    %c8_i32_24 = arith.constant 8 : i32
    %34 = arith.muli %arg2, %c8_i32_24 : i32
    %35 = tpu.iota {dimensions = array<i32: 1>} : vector<8x8xi32>
    %36 = vector.broadcast %34 : i32 to vector<8x8xi32>
    %37 = arith.addi %36, %35 : vector<8x8xi32>
    %38 = arith.cmpi sgt, %33, %37 : vector<8x8xi32>
    %cst_25 = arith.constant 9.99999995E+11 : f32
    %39 = vector.broadcast %cst_25 : f32 to vector<8x8xf32>
    %40 = arith.subf %29, %39 : vector<8x8xf32>
    %41 = arith.select %38, %40, %29 : vector<8x8xi1>, vector<8x8xf32>
    %c0_26 = arith.constant 0 : index
    %c0_27 = arith.constant 0 : index
    %42 = vector.load %arg7[%c0_26, %c0_27] : memref<32x4xf32, #tpu.memory_space<vmem>>, vector<32x4xf32>
    %cst_28 = arith.constant dense<0.000000e+00> : vector<8x4xf32>
    %43 = tpu.matmul %9, %42, %cst_28 {dimension_numbers = #tpu.dot_dimension_numbers<[1], [0], [0], [1], [0, 0, 1, 1], [], []>} : vector<8x32xf32>, vector<32x4xf32>, vector<8x4xf32> -> vector<8x4xf32>
    %c0_29 = arith.constant 0 : index
    %c0_30 = arith.constant 0 : index
    %44 = vector.load %arg8[%c0_29, %c0_30] : memref<1x4xf32, #tpu.memory_space<vmem>>, vector<1x4xf32>
    %45 = vector.broadcast %44 : vector<1x4xf32> to vector<8x4xf32>
    %46 = arith.addf %43, %45 : vector<8x4xf32>
    %c0_31 = arith.constant 0 : index
    %c0_32 = arith.constant 0 : index
    %47 = vector.load %arg9[%c0_31, %c0_32] : memref<32x4xf32, #tpu.memory_space<vmem>>, vector<32x4xf32>
    %cst_33 = arith.constant dense<0.000000e+00> : vector<4x8xf32>
    %48 = tpu.matmul %47, %12, %cst_33 {dimension_numbers = #tpu.dot_dimension_numbers<[0], [1], [1], [0], [0, 1, 1, 0], [], []>} : vector<32x4xf32>, vector<8x32xf32>, vector<4x8xf32> -> vector<4x8xf32>
    %c0_34 = arith.constant 0 : index
    %c0_35 = arith.constant 0 : index
    %49 = vector.load %arg10[%c0_34, %c0_35] : memref<4x1xf32, #tpu.memory_space<vmem>>, vector<4x1xf32>
    %50 = vector.broadcast %49 : vector<4x1xf32> to vector<4x8xf32>
    %51 = arith.addf %48, %50 : vector<4x8xf32>
    %52 = vector.extract_strided_slice %46 {offsets = [0, 0], sizes = [8, 1], strides = [1, 1]} : vector<8x4xf32> to vector<8x1xf32>
    %53 = vector.broadcast %52 : vector<8x1xf32> to vector<8x8xf32>
    %54 = arith.addf %41, %53 : vector<8x8xf32>
    %55 = vector.extract_strided_slice %51 {offsets = [0, 0], sizes = [1, 8], strides = [1, 1]} : vector<4x8xf32> to vector<1x8xf32>
    %56 = vector.broadcast %55 : vector<1x8xf32> to vector<8x8xf32>
    %57 = arith.addf %54, %56 : vector<8x8xf32>
    %c0_36 = arith.constant 0 : index
    %c0_37 = arith.constant 0 : index
    %c0_38 = arith.constant 0 : index
    %c0_39 = arith.constant 0 : index
    %58 = vector.load %arg16[%c0_36, %c0_37, %c0_38, %c0_39] : memref<1x4x8x8xf32, #tpu.memory_space<vmem>>, vector<1x1x8x8xf32>
    %59 = vector.shape_cast %58 : vector<1x1x8x8xf32> to vector<8x8xf32>
    %60 = vector.shape_cast %57 : vector<8x8xf32> to vector<1x1x8x8xf32>
    tpu.vector_store %arg16[%c0_36, %c0_37, %c0_38, %c0_39], %60 {strides = array<i32>} : memref<1x4x8x8xf32, #tpu.memory_space<vmem>>, vector<1x1x8x8xf32>,
    %61 = vector.extract_strided_slice %46 {offsets = [0, 1], sizes = [8, 1], strides = [1, 1]} : vector<8x4xf32> to vector<8x1xf32>
    %62 = vector.broadcast %61 : vector<8x1xf32> to vector<8x8xf32>
    %63 = arith.addf %41, %62 : vector<8x8xf32>
    %64 = vector.extract_strided_slice %51 {offsets = [1, 0], sizes = [1, 8], strides = [1, 1]} : vector<4x8xf32> to vector<1x8xf32>
    %65 = vector.broadcast %64 : vector<1x8xf32> to vector<8x8xf32>
    %66 = arith.addf %63, %65 : vector<8x8xf32>
    %c0_40 = arith.constant 0 : index
    %c1 = arith.constant 1 : index
    %c0_41 = arith.constant 0 : index
    %c0_42 = arith.constant 0 : index
    %67 = vector.load %arg16[%c0_40, %c1, %c0_41, %c0_42] : memref<1x4x8x8xf32, #tpu.memory_space<vmem>>, vector<1x1x8x8xf32>
    %68 = vector.shape_cast %67 : vector<1x1x8x8xf32> to vector<8x8xf32>
    %69 = vector.shape_cast %66 : vector<8x8xf32> to vector<1x1x8x8xf32>
    tpu.vector_store %arg16[%c0_40, %c1, %c0_41, %c0_42], %69 {strides = array<i32>} : memref<1x4x8x8xf32, #tpu.memory_space<vmem>>, vector<1x1x8x8xf32>,
    %70 = vector.extract_strided_slice %46 {offsets = [0, 2], sizes = [8, 1], strides = [1, 1]} : vector<8x4xf32> to vector<8x1xf32>
    %71 = vector.broadcast %70 : vector<8x1xf32> to vector<8x8xf32>
    %72 = arith.addf %41, %71 : vector<8x8xf32>
    %73 = vector.extract_strided_slice %51 {offsets = [2, 0], sizes = [1, 8], strides = [1, 1]} : vector<4x8xf32> to vector<1x8xf32>
    %74 = vector.broadcast %73 : vector<1x8xf32> to vector<8x8xf32>
    %75 = arith.addf %72, %74 : vector<8x8xf32>
    %c0_43 = arith.constant 0 : index
    %c2 = arith.constant 2 : index
    %c0_44 = arith.constant 0 : index
    %c0_45 = arith.constant 0 : index
    %76 = vector.load %arg16[%c0_43, %c2, %c0_44, %c0_45] : memref<1x4x8x8xf32, #tpu.memory_space<vmem>>, vector<1x1x8x8xf32>
    %77 = vector.shape_cast %76 : vector<1x1x8x8xf32> to vector<8x8xf32>
    %78 = vector.shape_cast %75 : vector<8x8xf32> to vector<1x1x8x8xf32>
    tpu.vector_store %arg16[%c0_43, %c2, %c0_44, %c0_45], %78 {strides = array<i32>} : memref<1x4x8x8xf32, #tpu.memory_space<vmem>>, vector<1x1x8x8xf32>,
    %79 = vector.extract_strided_slice %46 {offsets = [0, 3], sizes = [8, 1], strides = [1, 1]} : vector<8x4xf32> to vector<8x1xf32>
    %80 = vector.broadcast %79 : vector<8x1xf32> to vector<8x8xf32>
    %81 = arith.addf %41, %80 : vector<8x8xf32>
    %82 = vector.extract_strided_slice %51 {offsets = [3, 0], sizes = [1, 8], strides = [1, 1]} : vector<4x8xf32> to vector<1x8xf32>
    %83 = vector.broadcast %82 : vector<1x8xf32> to vector<8x8xf32>
    %84 = arith.addf %81, %83 : vector<8x8xf32>
    %c0_46 = arith.constant 0 : index
    %c3 = arith.constant 3 : index
    %c0_47 = arith.constant 0 : index
    %c0_48 = arith.constant 0 : index
    %85 = vector.load %arg16[%c0_46, %c3, %c0_47, %c0_48] : memref<1x4x8x8xf32, #tpu.memory_space<vmem>>, vector<1x1x8x8xf32>
    %86 = vector.shape_cast %85 : vector<1x1x8x8xf32> to vector<8x8xf32>
    %87 = vector.shape_cast %84 : vector<8x8xf32> to vector<1x1x8x8xf32>
    tpu.vector_store %arg16[%c0_46, %c3, %c0_47, %c0_48], %87 {strides = array<i32>} : memref<1x4x8x8xf32, #tpu.memory_space<vmem>>, vector<1x1x8x8xf32>,
    return
  }
  func.func @transform_0(%arg0: i32, %arg1: i32, %arg2: i32) -> (i32, i32, i32) {
    %c0_i32 = arith.constant 0 : i32
    %c0_i32_0 = arith.constant 0 : i32
    return %arg0, %arg1, %c0_i32 : i32, i32, i32
  }
  func.func @transform_1(%arg0: i32, %arg1: i32, %arg2: i32) -> (i32, i32, i32) {
    %c0_i32 = arith.constant 0 : i32
    %c0_i32_0 = arith.constant 0 : i32
    return %arg0, %arg2, %c0_i32 : i32, i32, i32
  }
  func.func @transform_2(%arg0: i32, %arg1: i32, %arg2: i32) -> (i32, i32) {
    %c0_i32 = arith.constant 0 : i32
    %c0_i32_0 = arith.constant 0 : i32
    %c0_i32_1 = arith.constant 0 : i32
    return %c0_i32, %c0_i32_0 : i32, i32
  }
  func.func @transform_3(%arg0: i32, %arg1: i32, %arg2: i32) -> (i32, i32) {
    %c0_i32 = arith.constant 0 : i32
    %c0_i32_0 = arith.constant 0 : i32
    %c0_i32_1 = arith.constant 0 : i32
    return %c0_i32, %c0_i32_0 : i32, i32
  }
  func.func @transform_4(%arg0: i32, %arg1: i32, %arg2: i32) -> (i32, i32) {
    %c0_i32 = arith.constant 0 : i32
    %c0_i32_0 = arith.constant 0 : i32
    %c0_i32_1 = arith.constant 0 : i32
    return %c0_i32, %c0_i32_0 : i32, i32
  }
  func.func @transform_5(%arg0: i32, %arg1: i32, %arg2: i32) -> (i32, i32) {
    %c0_i32 = arith.constant 0 : i32
    %c0_i32_0 = arith.constant 0 : i32
    %c0_i32_1 = arith.constant 0 : i32
    return %c0_i32, %c0_i32_0 : i32, i32
  }
  func.func @transform_6(%arg0: i32, %arg1: i32, %arg2: i32) -> (i32, i32) {
    %c0_i32 = arith.constant 0 : i32
    %c0_i32_0 = arith.constant 0 : i32
    %c0_i32_1 = arith.constant 0 : i32
    return %c0_i32, %c0_i32_0 : i32, i32
  }
  func.func @transform_7(%arg0: i32, %arg1: i32, %arg2: i32) -> (i32, i32) {
    %c0_i32 = arith.constant 0 : i32
    %c0_i32_0 = arith.constant 0 : i32
    %c0_i32_1 = arith.constant 0 : i32
    return %c0_i32, %c0_i32_0 : i32, i32
  }
  func.func @transform_8(%arg0: i32, %arg1: i32, %arg2: i32) -> (i32, i32) {
    %c0_i32 = arith.constant 0 : i32
    %c0_i32_0 = arith.constant 0 : i32
    return %arg1, %c0_i32 : i32, i32
  }
  func.func @transform_9(%arg0: i32, %arg1: i32, %arg2: i32) -> (i32, i32) {
    %c0_i32 = arith.constant 0 : i32
    %c0_i32_0 = arith.constant 0 : i32
    return %arg1, %c0_i32 : i32, i32
  }
  func.func @transform_10(%arg0: i32, %arg1: i32, %arg2: i32) -> (i32, i32) {
    %c0_i32 = arith.constant 0 : i32
    %c0_i32_0 = arith.constant 0 : i32
    return %arg2, %c0_i32 : i32, i32
  }
  func.func @transform_11(%arg0: i32, %arg1: i32, %arg2: i32) -> (i32, i32) {
    %c0_i32 = arith.constant 0 : i32
    %c0_i32_0 = arith.constant 0 : i32
    return %arg2, %c0_i32 : i32, i32
  }
  func.func @transform_12(%arg0: i32, %arg1: i32, %arg2: i32) -> (i32, i32) {
    %c0_i32 = arith.constant 0 : i32
    %c0_i32_0 = arith.constant 0 : i32
    %c0_i32_1 = arith.constant 0 : i32
    return %c0_i32, %c0_i32_0 : i32, i32
  }
  func.func @transform_13(%arg0: i32, %arg1: i32, %arg2: i32) -> (i32, i32, i32, i32) {
    %c0_i32 = arith.constant 0 : i32
    %c0_i32_0 = arith.constant 0 : i32
    return %arg0, %c0_i32, %arg1, %arg2 : i32, i32, i32, i32
  }
}

</mosaic_0001>

<bundles_post_ra>
// kernel: tpu_custom_call.1
= control target key start
LH: loop header
LB: loop body
LE: loop exit
PB: predicated region body
PF: predicated region fallthrough
CT: control target
= control target key end

     0   :  { %18 = vsyncpa [#allocation3], 0  ;;  %s2108_s0 = inlined_call_operand.vmem [shape: f32[2,8,32], index: 0, kind: input, shape index: {}]   ;;  %s2109_s1 = inlined_call_operand.vmem [shape: f32[2,8,32], index: 1, kind: input, shape index: {}]   ;;  %s2110_s2 = inlined_call_operand.vmem [shape: f32[32,32], index: 2, kind: input, shape index: {}]   ;;  %s2111_s3 = inlined_call_operand.hbm [shape: f32[1,32], index: 3, kind: input, shape index: {}]   ;;  %s2112_s4 = inlined_call_operand.vmem [shape: f32[32,4], index: 4, kind: input, shape index: {}]   ;;  %s2113_s5 = inlined_call_operand.vmem [shape: f32[1,4], index: 5, kind: input, shape index: {}]   ;;  %s2114_s6 = inlined_call_operand.vmem [shape: f32[32,4], index: 6, kind: input, shape index: {}]   ;;  %s2115_s7 = inlined_call_operand.vmem [shape: f32[4,1], index: 7, kind: input, shape index: {}]   ;;  %s2116_s8 = inlined_call_operand.vmem [shape: f32[8,16], index: 8, kind: input, shape index: {}]   ;;  %s2117_s9 = inlined_call_operand.vmem [shape: f32[8,16], index: 9, kind: input, shape index: {}]   ;;  %s2118_s10 = inlined_call_operand.vmem [shape: f32[8,16], index: 10, kind: input, shape index: {}]   ;;  %s2119_s11 = inlined_call_operand.vmem [shape: f32[8,16], index: 11, kind: input, shape index: {}]   ;;  %s2120_s12 = inlined_call_operand.vmem [shape: f32[16,16], index: 12, kind: input, shape index: {}]   ;;  %s2121_s13 = inlined_call_operand.hbm [shape: f32[2,4,8,8], index: 13, kind: output, shape index: {}]  }
   0x1   :  { %19 = vsyncpa [#allocation4], 0 }
   0x2   :  { %21 = vsyncpa [#allocation4 + $0x1], 0  ;;  %s1849_s25 = smov 0   ;;  %s1851_s26 = smov 0  }
   0x3   :  { %s1853_s27 = smov 0   ;;  %s1855_s28 = smov 0  }
   0x4   :  { %s1857_s29 = smov 0   ;;  %s1859_s30 = smov 0  }
   0x5 LB: > { %2130 = sst [smem:[#allocation8_spill]] %s1752_s27  ;;  %s1431_s14 = sadd.s32 4294967295, %s1764_s30   ;;  %s1764_s30 = sphi %s1859_s30, %s27_s30   ;;  %s1760_s29 = sphi %s1857_s29, %s2148_s29   ;;  %s1756_s28 = sphi %s1855_s28, %s2147_s28   ;;  %s1752_s27 = sphi %s1853_s27, %s2146_s27   ;;  %s1748_s26 = sphi %s1851_s26, %s2150_s26   ;;  %s1744_s25 = sphi %s1849_s25, %s2149_s25  }
   0x6   : > { %2131 = sst [smem:[#allocation9_spill]] %s1760_s29  ;;  %s1432_s15 = sadd.s32 4294967294, %s1764_s30  }
   0x7   : > { %s46_s16 = sadd.s32 1, %s1760_s29  ;;  %s364_s17 = sadd.s32 1, %s1752_s27 }
   0x8   : > { %p48_p0 = scmp.ge.s32.totalorder %s46_s16, 2  ;;  %p374_p1 = scmp.ne.s32.totalorder %s1752_s27, %s1748_s26 }
   0x9   : > { %p375_p2 = scmp.eq.s32.totalorder %s1431_s14, 1  ;;  %p380_p3 = scmp.ne.s32.totalorder %s1748_s26, %s1744_s25 }
   0xa   : > { %s2152_s16 = smov (%p48_p0, %s46_s16), 0  ;;  %p381_p5 = scmp.eq.s32.totalorder %s1432_s15, 1 }
   0xb   : > { %2132 = sst [smem:[#allocation10_spill]] %s2152_s16  ;;  %p1889_p4 = por %p375_p2, %p374_p1 }
   0xc   : > { %s357_s19 = ssub.s32 %s1760_s29, %s2152_s16  ;;  %p1433_p6 = scmp.ge.s32.totalorder %s1764_s30, 1 }
   0xd   : > { %s2133_s18 = scalar_select %p1889_p4, 1, 0 }
   0xe   : > { %p362_p7 = scmp.eq.s32.totalorder %s357_s19, 0  ;;  %p1896_p8 = por %p381_p5, %p380_p3 }
   0xf   : > { %p388_p9 = scmp.lt.s32.totalorder %s1764_s30, 3  ;;  %p1908_p11 = scmp.eq.s32.totalorder %s1431_s14, 0 }
  0x10   : > { %s2134_s20 = scalar_select %p1896_p8, 1, 0 }
  0x11   : > { %s1902_s21 = scalar_select %p362_p7, %s1752_s27, %s364_s17  }
  0x12   : > { %2135 = sst [smem:[#allocation11_spill]] %s2134_s20  ;;  %p1904_p10 = pnand %p1433_p6, %p388_p9 }
  0x13   : > { %2136 = sst [smem:[#allocation12_spill]] %s1902_s21  ;;  %s1766_s24 = smov [#allocation2]  }
  0x14   : > { %s2137_s22 = scalar_select %p1904_p10, 1, 0 }
  0x15   : > { %s2138_s23 = scalar_select %p1908_p11, 1, 0 }
  0x16   : > { %p1578_p12 = pneg %p1904_p10  ;;  %s404_s15 = sshll.u32 %s1766_s24, 4  ;;  %s405_s15 = int_to_ptr.vmem [resolvable:$true] %s404_s15 }
  0x17   : > { %s1654_s29 = scalar_lea.hbm %s2111_s3, 16 }
  0x18   : > { %p1916_p13 = pnand %p1908_p11, %p1578_p12  ;;  %p1655_p0 = scmp.ne.s32.totalorder %s2111_s3, %s1654_s29 }
  0x19   : > { %p1661_p5 = scmp.lt.u32.totalorder %s1654_s29, %s2111_s3 }
  0x1a   : > { %p1656_p1 = pneg %p1916_p13 }
  0x1c   : > { %p1657_p2 = pnand %p1656_p1, %p1655_p0 }
  0x1e   : > { %p1658_p3 = pneg %p1657_p2 }
  0x20   : > { %p1663_p6 = pnand %p1661_p5, %p1658_p3 }
  0x22   : > { %1666 = shalt.err (!%p1663_p6)
}
  0x23   : > { %s1667_s20 = scalar_lea.vmem %s405_s15, 16  ;;  %s1674_s16 = scalar_lea.vmem %s405_s15, 32 }
  0x24   : > { %p1668_p7 = scmp.ne.s32.totalorder %s405_s15, %s1667_s20  ;;  %p1675_p8 = scmp.lt.s32.totalorder %s405_s15, %s405_s15 }
  0x25   : > { %p1676_p4 = scmp.lt.s32.totalorder %s1674_s16, %s1667_s20 }
  0x26   : > { %p1670_p9 = pnand %p1668_p7, %p1656_p1 }
  0x27   : > { %p1677_p11 = por %p1676_p4, %p1675_p8 }
  0x28   : > { %p1671_p12 = pneg %p1670_p9 }
  0x2a   : > { %p1678_p10 = pnand %p1677_p11, %p1671_p12 }
  0x2c   : > { %1681 = shalt.err (!%p1678_p10)
}
  0x2d   : > { %1581 = dma.hbm_to_vmem [thread:$0]  (!%p1916_p13), %s2111_s3, 16, %s405_s15, [#allocation3]  }
  0x2e   : > { %p2140_p0 = scmp.ne.s32.totalorder %s2137_s22, 0 }
  0x2f   : > { %p2141_p2 = scmp.ne.s32.totalorder (!%p2140_p0), %s2138_s23, 0 }
  0x30   : > { %480 = sbr.rel (%p2140_p0) target bundleno = 1083 (0x43b), region = 72 }
  0x37   : > { %1735 = dma.done.wait (%p2141_p2), [#allocation3], 16  }
  0x38   : > { %1737 = vsyncadd (%p2141_p2), [#allocation3], 4294967280  ;;  %p549_p4 = scmp.lt.s32.totalorder %s1756_s28, 1  ;;  %v1767_v0 = vmov 0.0|0.0   ;;  %vm1768_vm0 = vmmov 0   ;;  %v1769_v1 = vmov 0.0   ;;  %v988_v61 = vlaneseq }
  0x39   : > { %1554 = vmatprep.subr.bf16.mxu1 %v1767_v0  ;;  %1510 = vmatprep.mubr.msk.f32.mxu1 %vm1768_vm0, %v1769_v1  ;;  %v581_v2 = vld [vmem:[%s2110_s2] sm:$0xff]  ;;  %v582_v3 = vld [vmem:[%s2110_s2 + $0x8] sm:$0xff]  ;;  %v583_v4 = vld [vmem:[%s2110_s2 + $0x10] sm:$0xff]  ;;  %vm594_vm1 = vcmask 261120   ;;  %vm743_vm2 = vcmask 130048   ;;  %s1770_s24 = smov 112  }
  0x3a   : > { %1548 = vmatprep.subr.bf16.mxu0 %v1767_v0  ;;  %1499 = vmatprep.mubr.msk.f32.mxu0 %vm1768_vm0, %v1769_v1  ;;  %s550_s27 = scalar_select %p549_p4, %s1756_s28, 1  ;;  %v1549_v5 = vpack.c.bf16 %v582_v3, %v581_v2  ;;  %v584_v6 = vld [vmem:[%s2110_s2 + $0x18] sm:$0xff]  ;;  %v586_v10 = vld [vmem:[%s2120_s12] sm:$0xff]  ;;  %v587_v11 = vld [vmem:[%s2120_s12 + $0x8] sm:$0xff]  ;;  %v1772_v33 = vmov 0   ;;  %v1773_v41 = vmov 3  }
  0x3b   : > { %v1552_v7 = vpack.c.bf16 %v584_v6, %v583_v4  ;;  %v1561_v12 = vpack.c.bf16 %v587_v11, %v586_v10  ;;  %v1445_v13 = vld [vmem:[#allocation2] ss:$0 sm:$0xff]  ;;  %s1771_s17 = smov 16   ;;  %v1001_v22 = vld [vmem:[%s2112_s4 + $0x8] sm:$0xff]  ;;  %v1002_v25 = vld [vmem:[%s2112_s4 + $0x10] sm:$0xff]  ;;  %1649 = vset.pattern.permute.xlu1 %v1772_v33  ;;  %v1774_v49 = vmov 1  }
  0x3c   : > { %s1443_s16 = sshll.u32 %s550_s27, 3  ;;  %1556 = vmatpush3.bf16.msra.mxu1 %v1549_v5  ;;  %1550 = vmatpush3.bf16.msra.mxu0 %v1549_v5  ;;  %v820_v20 = vld [vmem:[%s2118_s10] sm:$0xff]  ;;  %v1003_v26 = vld [vmem:[%s2112_s4 + $0x18] sm:$0xff]  ;;  %v1084_v29 = vld [vmem:[%s2114_s6 + $0x8] sm:$0xff]  ;;  %v1775_v50 = vmov 2   ;;  %v989_v63 = vshrl.u32 %v988_v61, 7 }
  0x3d   : > { %1557 = vmatprep.subr.bf16.mxu1 %v1767_v0  ;;  %s562_s29 = scalar_lea.vmem %s2109_s1, %s1443_s16  ;;  %1551 = vmatprep.subr.bf16.mxu0 %v1767_v0  ;;  %s555_s23 = scalar_lea.vmem %s2108_s0, %s1443_s16  ;;  %v1000_v21 = vld [vmem:[%s2112_s4] sm:$0xff]  ;;  %v1570_v27 = vpack.c.bf16 %v1003_v26, %v1002_v25  ;;  %v1085_v32 = vld [vmem:[%s2114_s6 + $0x10] sm:$0xff]  ;;  %v1086_v34 = vld [vmem:[%s2114_s6 + $0x18] sm:$0xff]  ;;  %vm1211_vm4 = vcmask 64512  }
  0x3e   : > { %v580_v8 = vld [vmem:[%s562_s29] sm:$0xff]  ;;  %v1567_v23 = vpack.c.bf16 %v1001_v22, %v1000_v21  ;;  %s546_s27 = sand.u32 1, %s1748_s26   ;;  %v1208_v6 = vsub.s32 0, %v989_v63  ;;  %s1465_s19 = sshll.u32 %s1756_s28, 9 }
  0x3f   : > { %v579_v9 = vld [vmem:[%s555_s23] sm:$0xff]  ;;  %s1442_s15 = sshll.u32 %s546_s27, 5  ;;  %s2056_s20 = scalar_lea.hbm %s2121_s13, %s1465_s19 }
  0x40   : > { %1559 = vmatpush3.bf16.msra.mxu1 %v1552_v7  ;;  %1553 = vmatpush3.bf16.msra.mxu0 %v1552_v7  ;;  %v1083_v28 = vld [vmem:[%s2114_s6] sm:$0xff]  ;;  %s548_s14 = scalar_lea.vmem [#allocation5], %s1442_s15  ;;  %s2062_s28 = scalar_lea.sflag [#allocation4], %s546_s27 }
  0x41   : > { %1563 = vmatprep.subr.bf16.mxu1 %v1767_v0  ;;  %1560 = vmatprep.subr.bf16.mxu0 %v1767_v0  ;;  %v901_v35 = vld [vmem:[%s2119_s11] sm:$0xff]  ;;  %s1265_s16 = sshll.u32 %s548_s14, 4  ;;  %p2142_p10 = scmp.ne.s32.totalorder %s2133_s18, 0  ;;  %s2058_s16 = int_to_ptr.vmem [resolvable:$true] %s1265_s16 }
  0x42   : > { %v1087_v46 = vld [vmem:[%s2115_s7] sm:$0xf] }
  0x43   : > { %1511 = vmatmul.mubr.msk.f32.vlgmr.msra.gmra.mrb[0].mxu1 %vm594_vm1, %v580_v8  ;;  %1500 = vmatmul.mubr.msk.f32.vlgmr.msra.gmra.mrb[0].mxu0 %vm594_vm1, %v579_v9  ;;  %v1453_v47 = vld [vmem:[%s2113_s5] ss:$0 sm:$0xff]  ;;  %v1232_v8 = vsub.s32 2, %v989_v63  ;;  %v1244_v9 = vsub.s32 3, %v989_v63 }
  0x44   : > { %1524 = vmatprep.mubr.msk.f32.mxu1 %vm1768_vm0, %v1769_v1  ;;  %1517 = vmatprep.mubr.msk.f32.mxu0 %vm1768_vm0, %v1769_v1  ;;  %v741_v51 = vld [vmem:[%s2116_s8] sm:$0xff] }
  0x45   : > { %1565 = vmatpush3.bf16.msra.mxu1 %v1561_v12  ;;  %1562 = vmatpush3.bf16.msra.mxu0 %v1561_v12  ;;  %v817_v52 = vld [vmem:[%s2117_s9] sm:$0xff] }
  0x46   : > { %1566 = vmatprep.subr.bf16.mxu1 %v1767_v0  ;;  %1527 = vmatprep.subr.mxu0 %v1769_v1 }
 0x116   : > { %v737_v14 = vpop.f32.mrb[0].mxu1  ;;  %v664_v15 = vpop.f32.mrb[0].mxu0 }
 0x117   : > { %v1979_v16 = vadd.f32 %v1445_v13, %v737_v14  ;;  %v1512_v17 = vpop.f32.mrb[1].mxu1  ;;  %v1981_v18 = vadd.f32 %v1445_v13, %v664_v15  ;;  %v1501_v19 = vpop.f32.mrb[1].mxu0 }
 0x119   : > { %827 = vrot.lane.b32.xlu0 %v1979_v16, %s1770_s24  ;;  %1518 = vmatmul.mubr.msk.f32.vlgmr.msra.gmra.mrb[2].mxu0 %vm743_vm2, %v1981_v18  ;;  %v742_v53 = vmul.f32 %v741_v51, %v1981_v18 }
 0x11a   : > { %1529 = vmatprep.mubr.msk.f32.mxu0 %vm1768_vm0, %v1769_v1 }
 0x11d   : > { %822 = vrot.lane.b32.xlu0 %v820_v20, %s1771_s17 }
 0x13b   : > { %1093 = vxpose.xlu0.b32.start [1/4] (short) (narrow) %v1083_v28, 8 }
 0x13f   : > { %1094 = vxpose.xlu0.b32.cont [2/4] (short) (narrow) %v1084_v29, 8 }
 0x143   : > { %1095 = vxpose.xlu0.b32.cont [3/4] (short) (narrow) %v1085_v32, 8 }
 0x147   : > { %1096 = vxpose.xlu0.b32.end [4/4] (short) (narrow) %v1086_v34, 8 }
 0x170   : > { %1653 = vset.pattern.permute.xlu0 %v1773_v41 }
 0x18b   : > { %v828_v24 = vpop.permute.xlu0 %827 }
 0x18c   : > { %1525 = vmatmul.mubr.msk.f32.vlgmr.msra.gmra.mrb[2].mxu1 %vm743_vm2, %v828_v24 }
 0x18d   : > { %1568 = vmatpush3.bf16.msra.mxu1 %v1567_v23  ;;  %1540 = vmatprep.mubr.msk.f32.mxu1 %vm1768_vm0, %v1769_v1 }
 0x18e   : > { %1569 = vmatprep.subr.bf16.mxu1 %v1767_v0  ;;  %v994_v0 = vand.u32 127, %v988_v61 }
 0x18f   : > { %v823_v42 = vpop.permute.xlu0 %822 }
 0x190   : > { %v825_v43 = vmul.f32 %v823_v42, %v1979_v16  ;;  %vm997_vm3 = vcmp.gt.s32.totalorder %v989_v63, %v994_v0 }
 0x191   : > { %1571 = vmatpush3.bf16.msra.mxu1 %v1570_v27 }
 0x194   : > { %1541 = vmatmul.mubr.msk.f32.vlgmr.msra.gmra.mrb[4].mxu1 %vm594_vm1, %v1981_v18 }
 0x1bb   : > { %v1109_v58 = vpop.trf.xlu0 }
 0x1ec   : > { %v813_v30 = vpop.f32.mrb[2].mxu0 }
 0x1ed   : > { %v1519_v31 = vpop.f32.mrb[3].mxu0  ;;  %v818_v54 = vmul.f32 %v817_v52, %v813_v30 }
 0x1ef   : > { %v819_v55 = vadd.f32 %v818_v54, %v742_v53 }
 0x1f1   : > { %v908_v57 = vmul.f32 0.25, %v819_v55 }
 0x25f   : > { %v897_v36 = vpop.f32.mrb[2].mxu1 }
 0x260   : > { %v902_v37 = vmul.f32 %v901_v35, %v897_v36  ;;  %v1526_v38 = vpop.f32.mrb[3].mxu1 }
 0x262   : > { %904 = vrot.lane.b32.xlu1 %v902_v37, %s1771_s17  ;;  %s1776_s17 = smov [#allocation5]  }
 0x263   : > { %s1686_s22 = sshll.u32 %s1776_s17, 4  ;;  %s1687_s22 = int_to_ptr.vmem [resolvable:$false] %s1686_s22 }
 0x264   : > { %s1688_s23 = scalar_lea.vmem %s1687_s22, 1024  ;;  %p1689_p1 = scmp.lt.s32.totalorder %s2058_s16, %s1687_s22 }
 0x267   : > { %v1079_v39 = vpop.f32.mrb[4].mxu1 }
 0x268   : > { %v1542_v40 = vpop.f32.mrb[5].mxu1  ;;  %v1080_v48 = vadd.f32 %v1453_v47, %v1079_v39 }
 0x2d4   : > { %v905_v44 = vpop.permute.xlu1 %904 }
 0x2d5   : > { %v907_v45 = vadd.f32 %v905_v44, %v825_v43 }
 0x2d7   : > { %910 = vrot.lane.b32.xlu1 %v907_v45, %s1770_s24  ;;  %s1682_s24 = scalar_lea.vmem %s2058_s16, 512 }
 0x2d8   : > { %p1683_p8 = scmp.ne.s32.totalorder %s2058_s16, %s1682_s24  ;;  %p1690_p3 = scmp.lt.s32.totalorder %s1688_s23, %s1682_s24 }
 0x2da   : > { %p1684_p11 = pnand %p1683_p8, %p2142_p10  ;;  %p1691_p5 = por %p1690_p3, %p1689_p1 }
 0x2db   : > { %1090 = vperm.xlu1 %1649, %v1087_v46  }
 0x2dc   : > { %p1685_p13 = pneg %p1684_p11 }
 0x2de   : > { %p1692_p6 = pnand %p1691_p5, %p1685_p13 }
 0x2df   : > { %1202 = vperm.xlu1 %1649, %v1080_v48  }
 0x2e3   : > { %1650 = vset.pattern.permute.xlu1 %v1774_v49 }
 0x2e4   : > { %1214 = vperm.xlu1 %1650, %v1080_v48  }
 0x2e8   : > { %1651 = vset.pattern.permute.xlu1 %v1775_v50 }
 0x2e9   : > { %1226 = vperm.xlu1 %1651, %v1080_v48  }
 0x2ed   : > { %1652 = vset.pattern.permute.xlu1 %v1773_v41 }
 0x2ee   : > { %1238 = vperm.xlu1 %1652, %v1080_v48  }
 0x349   : > { %v911_v56 = vpop.permute.xlu1 %910 }
 0x34a   : > { %1528 = vmatpush3.xpose.msk.msra.mxu0 %vm743_vm2, %v911_v56 }
 0x34b   : > { %1543 = vmatprep.subr.mxu0 %v1769_v1 }
 0x34d   : > { %1530 = vmatmul.mubr.msk.f32.vlgmr.msra.gmra.mrb[4].mxu0 %vm743_vm2, %v908_v57 }
 0x34e   : > { %1544 = vmatpush3.xpose.msk.msra.mxu0 %vm594_vm1, %v1979_v16  ;;  %1545 = vmatprep.mubr.msk.f32.mxu0 %vm1768_vm0, %v1769_v1  ;;  %v1220_v1 = vsub.s32 1, %v989_v63 }
 0x351   : > { %1546 = vmatmul.mubr.msk.f32.vlgmr.msra.gmra.mrb[6].mxu0 %vm594_vm1, %v1109_v58 }
 0x35a   : > { %v1091_v59 = vpop.permute.xlu1 %1090 }
 0x35e   : > { %v1203_v60 = vpop.permute.xlu1 %1202 }
 0x363   : > { %v1215_v62 = vpop.permute.xlu1 %1214 }
 0x368   : > { %v1227_v2 = vpop.permute.xlu1 %1226 }
 0x36d   : > { %v1239_v11 = vpop.permute.xlu1 %1238 }
 0x420   : > { %v983_v3 = vpop.f32.mrb[4].mxu0 }
 0x421   : > { %v1452_v4 = vadd.f32 -1e+12, %v983_v3  ;;  %v1531_v5 = vpop.f32.mrb[5].mxu0 }
 0x423   : > { %v999_v7 = vsel %vm997_vm3, %v1452_v4, %v983_v3 }
 0x424   : > { %v1196_v10 = vpop.f32.mrb[6].mxu0  ;;  %v1205_v14 = vadd.f32 %v1203_v60, %v999_v7  ;;  %v1217_v15 = vadd.f32 %v1215_v62, %v999_v7  ;;  %v1229_v16 = vadd.f32 %v1227_v2, %v999_v7  ;;  %v1241_v17 = vadd.f32 %v1239_v11, %v999_v7 }
 0x425   : > { %v1197_v12 = vadd.f32 %v1196_v10, %v1091_v59  ;;  %v1547_v13 = vpop.f32.mrb[7].mxu0 }
 0x427   : > { %v1209_v18 = vrot.slane %v1197_v12, %v1208_v6  ;;  %v1221_v19 = vrot.slane %v1197_v12, %v1220_v1  ;;  %v1233_v20 = vrot.slane %v1197_v12, %v1232_v8  ;;  %v1245_v21 = vrot.slane %v1197_v12, %v1244_v9 }
 0x429   : > { %v1210_v22 = vadd.f32 %v1209_v18, %v1205_v14  ;;  %v1222_v23 = vadd.f32 %v1221_v19, %v1217_v15  ;;  %v1234_v24 = vadd.f32 %v1233_v20, %v1229_v16  ;;  %v1246_v25 = vadd.f32 %v1245_v21, %v1241_v17 }
 0x42b   : > { %1212 = vst.msk [vmem:[%s548_s14] sm:$0xff] %vm1211_vm4, %v1210_v22  ;;  %1457 = vst.msk [vmem:[%s548_s14 + $0x8] sm:$0xff] %vm1211_vm4, %v1222_v23 }
 0x42c   : > { %1458 = vst.msk [vmem:[%s548_s14 + $0x10] sm:$0xff] %vm1211_vm4, %v1234_v24  ;;  %1459 = vst.msk [vmem:[%s548_s14 + $0x18] sm:$0xff] %vm1211_vm4, %v1246_v25 }
 0x42d   : > { %1695 = shalt.err (!%p1692_p6)
}
 0x42e   : > { %s1696_s27 = scalar_lea.hbm %s2056_s20, 512  ;;  %s1700_s14 = scalar_lea.hbm %s2121_s13, 1024 }
 0x42f   : > { %p1697_p7 = scmp.ne.s32.totalorder %s2056_s20, %s1696_s27  ;;  %p1701_p0 = scmp.lt.u32.totalorder %s2056_s20, %s2121_s13 }
 0x430   : > { %p1702_p2 = scmp.lt.u32.totalorder %s1700_s14, %s1696_s27  ;;  %p1704_p8 = scmp.lt.u32.totalorder %s1696_s27, %s2056_s20 }
 0x431   : > { %p1698_p9 = pnand %p1697_p7, %p2142_p10 }
 0x432   : > { %p1703_p4 = por %p1702_p2, %p1701_p0 }
 0x433   : > { %p1699_p12 = pneg %p1698_p9 }
 0x434   : > { %p1705_p11 = por %p1704_p8, %p1703_p4 }
 0x436   : > { %p1706_p13 = pnand %p1705_p11, %p1699_p12 }
 0x438   : > { %1709 = shalt.err (!%p1706_p13)
}
 0x439   : > { %s1777_s24 = smov 128   ;;  %s1778_s17 = smov 8  }
 0x43a   : > { %1576 = dma.vmem_to_hbm [thread:$0]  (%p2142_p10), %s2058_s16, 512, %s2056_s20, %s2062_s28, %s1777_s24, %s1777_s24, %s1778_s17  }
 0x43b PF: > { %s2143_s22 = sld [smem:[#allocation11_spill]]  ;;  %p1588_p1 = scmp.ge.s32.totalorder %s1764_s30, 2 }
 0x43c   : > { %s1280_s23 = sand.u32 1, %s1744_s25  }
 0x43d   : > { %s1281_s27 = scalar_lea.sflag [#allocation4], %s1280_s23 }
 0x441   : > { %p2144_p3 = scmp.ne.s32.totalorder %s2143_s22, 0 }
 0x443   : > { %p1583_p5 = pnand %p1588_p1, %p2144_p3 }
 0x445   : > { %1739 = dma.done.wait (!%p1583_p5), %s1281_s27, 512  }
 0x446   : > { %1741 = vsyncadd (!%p1583_p5), %s1281_s27, 4294966784  ;;  %s27_s30 = sadd.s32 1, %s1764_s30   ;;  %s2145_s15 = sld [smem:[#allocation8_spill]] }
 0x447   : > { %p24_p6 = scmp.ge.s32.totalorder %s27_s30, 4   ;;  %s2146_s27 = sld [smem:[#allocation12_spill]] }
 0x448   : > { %s2147_s28 = sld [smem:[#allocation9_spill]]  ;;  %s2148_s29 = sld [smem:[#allocation10_spill]] }
 0x449   : > { %s2149_s25 = smov %s1748_s26  ;;  %26 = sbr.rel (!%p24_p6) target bundleno = 5 (0x5), region = 130 }
 0x44c   : > { %s2150_s26 = smov %s2145_s15 }
 0x450   :  { %1286 = vsyncpa [#allocation3], 1 }
 0x451   :  { %1288 = vsyncpa [#allocation3 + $0x1], 1 }
 0x452   :  { %1289 = vsyncpa [#allocation4], 1 }
 0x453   :  { %1291 = vsyncpa [#allocation4 + $0x1], 1 }

</bundles_post_ra>
